<compile_context>
chip_gen: v7x
topology: tpu7x:2x2x1
jax: 0.10.0
libtpu: 0.0.40
codegen_flags: <defaults>
</compile_context>

<pallas_src>
import numpy as np
import jax
import jax.numpy as jnp
from jax import lax
from jax.experimental import pallas as pl
from jax.experimental.pallas import tpu as pltpu

LEAKY_SLOPE = 0.2
BN_EPS = 1e-5


def _round_up(x, m):
    return ((x + m - 1) // m) * m


def deconv_to_matrix(w, h_in, w_in, stride, pad):
    """ConvTranspose2d weight (Cin, Cout, kh, kw) -> dense matrix
    M of shape (Cin*Hin*Win, Cout*Hout*Wout) acting on row-major flat maps."""
    c_in, c_out, kh, kw = w.shape
    h_out = (h_in - 1) * stride - 2 * pad + kh
    w_out = (w_in - 1) * stride - 2 * pad + kw
    m = np.zeros((c_in * h_in * w_in, c_out * h_out * w_out), dtype=np.float32)
    wn = np.asarray(w, dtype=np.float32)
    for hi in range(h_in):
        for wi in range(w_in):
            for y in range(h_out):
                ky = y + pad - hi * stride
                if not (0 <= ky < kh):
                    continue
                for x in range(w_out):
                    kx = x + pad - wi * stride
                    if not (0 <= kx < kw):
                        continue
                    for ci in range(c_in):
                        row = ci * h_in * w_in + hi * w_in + wi
                        for co in range(c_out):
                            col = co * h_out * w_out + y * w_out + x
                            m[row, col] = wn[ci, co, ky, kx]
    return m, h_out, w_out


def _stats_kernel(x_ref, m1_ref, o_ref):
    """Accumulate per-flat-column sum (row 0) and sum of squares (row 1) of h = x @ M1."""
    @pl.when(pl.program_id(0) == 0)
    def _():
        o_ref[...] = jnp.zeros_like(o_ref)
    h = jnp.dot(x_ref[...], m1_ref[...],
                preferred_element_type=jnp.float32)               # (TB, HP) f32
    hs = jnp.sum(h, axis=0, keepdims=True)                        # (1, HP)
    hss = jnp.sum(h * h, axis=0, keepdims=True)                   # (1, HP)
    o_ref[...] = o_ref[...] + jnp.concatenate([hs, hss], axis=0)  # (2, HP) accumulator


def _main_kernel(x_ref, m1_ref, scale_ref, off_ref, m2_ref, b2_ref, o_ref):
    """Single pass: deconv1 -> folded BN (FMA) -> LeakyReLU -> deconv2 -> LeakyReLU."""
    h = jnp.dot(x_ref[...], m1_ref[...],
                preferred_element_type=jnp.float32)               # (TB, HP) f32
    hn = h * scale_ref[...] + off_ref[...]                        # folded BatchNorm
    ha = jnp.maximum(hn, LEAKY_SLOPE * hn)                        # LeakyReLU(0.2)
    y = jnp.dot(ha.astype(jnp.bfloat16), m2_ref[...],
                preferred_element_type=jnp.float32) + b2_ref[...]
    o_ref[...] = jnp.maximum(y, LEAKY_SLOPE * y).astype(o_ref.dtype)  # bf16 store


def flat_to_conv_forward(x, params, tile_rows=1024):
    """Forward of FlatToConv(channel_size=[C0,C1,C2], ks=4, s=2, p=1, a=LeakyReLU(0.2))."""
    w1, b1, gamma1, beta1, w2, b2 = params
    del b1  # cancels exactly under training-mode BatchNorm (mean subtraction)
    n, c0 = x.shape
    c1 = w1.shape[1]
    c2 = w2.shape[1]

    # --- host glue: deconv -> matmul matrices, padded lane-dense layouts ---
    m1, h1, w1sp = deconv_to_matrix(w1, 1, 1, stride=2, pad=1)        # (C0, C1*HW1)
    m2, h2, w2sp = deconv_to_matrix(w2, h1, w1sp, stride=2, pad=1)    # (C1*HW1, C2*HW2)
    hw1 = h1 * w1sp
    hw2 = h2 * w2sp
    hidden_w = c1 * hw1
    out_w = c2 * hw2

    HP = _round_up(hidden_w, 128)     # padded hidden flat width (keep at 128 multiples)
    OWP = _round_up(out_w, 128)       # padded output flat width

    m1p = np.zeros((c0, HP), np.float32)
    m1p[:, :hidden_w] = m1
    m2p = np.zeros((HP, OWP), np.float32)
    m2p[:hidden_w, :out_w] = m2
    b2_row = np.zeros((1, OWP), np.float32)
    b2_row[0, :out_w] = np.repeat(np.asarray(b2, np.float32), hw2)

    m1_bf = jnp.asarray(m1p, jnp.bfloat16)
    m2_bf = jnp.asarray(m2p, jnp.bfloat16)
    b2_j = jnp.asarray(b2_row)

    # --- batch tiling (zero-padded rows contribute nothing to the BN sums) ---
    TB = min(int(tile_rows), _round_up(n, 16))
    TB = _round_up(TB, 16)
    n_pad = _round_up(n, TB)
    num_tiles = n_pad // TB

    xp = x.astype(jnp.bfloat16)
    if n_pad != n:                    # skip the pad pass entirely when n % TB == 0
        xp = jnp.zeros((n_pad, c0), jnp.bfloat16).at[:n, :].set(xp)

    # --- call 1: tiny stats kernel (sum / sumsq per flat hidden column) ---
    stats = pl.pallas_call(
        _stats_kernel,
        out_shape=jax.ShapeDtypeStruct((2, HP), jnp.float32),
        grid_spec=pltpu.PrefetchScalarGridSpec(
            num_scalar_prefetch=0,
            grid=(num_tiles,),
            in_specs=[
                pl.BlockSpec((TB, c0), lambda t: (t, 0)),     # x (bf16), batch-tiled
                pl.BlockSpec((c0, HP), lambda t: (0, 0)),     # m1 (bf16), resident
            ],
            out_specs=pl.BlockSpec((2, HP), lambda t: (0, 0)),  # resident accumulator
        ),
        compiler_params=pltpu.CompilerParams(
            dimension_semantics=("arbitrary",)),
    )(xp, m1_bf)

    # --- BN finalization: once, in plain XLA (hoisted out of the per-tile loop) ---
    inv_cnt = 1.0 / float(n * hw1)    # BatchNorm2d reduces over (N, H, W) per channel
    sums = stats[:, :hidden_w].reshape(2, c1, hw1).sum(axis=-1)   # (2, C1)
    mean_c = sums[0] * inv_cnt
    var_c = jnp.maximum(sums[1] * inv_cnt - mean_c * mean_c, 0.0)
    inv_c = lax.rsqrt(var_c + BN_EPS)
    scale_c = inv_c * jnp.asarray(gamma1, jnp.float32)            # (C1,)
    off_c = jnp.asarray(beta1, jnp.float32) - mean_c * scale_c    # (C1,)
    scale_row = jnp.zeros((1, HP), jnp.float32).at[0, :hidden_w].set(
        jnp.repeat(scale_c, hw1))
    off_row = jnp.zeros((1, HP), jnp.float32).at[0, :hidden_w].set(
        jnp.repeat(off_c, hw1))

    # --- call 2: single-pass main kernel, batch axis parallel across TensorCores ---
    out_flat = pl.pallas_call(
        _main_kernel,
        out_shape=jax.ShapeDtypeStruct((n_pad, OWP), jnp.bfloat16),
        grid_spec=pltpu.PrefetchScalarGridSpec(
            num_scalar_prefetch=0,
            grid=(num_tiles,),
            in_specs=[
                pl.BlockSpec((TB, c0), lambda t: (t, 0)),     # x (bf16), batch-tiled
                pl.BlockSpec((c0, HP), lambda t: (0, 0)),     # m1 (bf16), resident
                pl.BlockSpec((1, HP), lambda t: (0, 0)),      # BN scale row (f32)
                pl.BlockSpec((1, HP), lambda t: (0, 0)),      # BN offset row (f32)
                pl.BlockSpec((HP, OWP), lambda t: (0, 0)),    # m2 (bf16), resident
                pl.BlockSpec((1, OWP), lambda t: (0, 0)),     # b2 row (f32)
            ],
            out_specs=pl.BlockSpec((TB, OWP), lambda t: (t, 0)),
        ),
        compiler_params=pltpu.CompilerParams(
            dimension_semantics=("parallel",),
            vmem_limit_bytes=32 * 1024 * 1024),
    )(xp, m1_bf, scale_row, off_row, m2_bf, b2_j)

    out = out_flat
    if n_pad != n:
        out = out[:n]
    if OWP != out_w:                  # no-op whenever C2*H2*W2 is a multiple of 128
        out = out[:, :out_w]
    return out.reshape(n, c2, h2, w2sp).astype(jnp.float32)   # NCHW, matches PyTorch


def jax_reference(x, w1, b1, gamma1, beta1, w2, b2):
    """Pure-JAX f32 reference (PyTorch ConvTranspose2d + training-mode BN semantics)."""
    def deconv(y, w, b, stride, pad):
        c_in, c_out, kh, kw = w.shape
        k = jnp.transpose(w, (1, 0, 2, 3))[:, :, ::-1, ::-1]   # OIHW, spatially flipped
        dn = lax.conv_dimension_numbers(y.shape, k.shape, ('NCHW', 'OIHW', 'NCHW'))
        out = lax.conv_general_dilated(
            y, k, window_strides=(1, 1),
            padding=((kh - 1 - pad, kh - 1 - pad), (kw - 1 - pad, kw - 1 - pad)),
            lhs_dilation=(stride, stride), rhs_dilation=(1, 1),
            dimension_numbers=dn)
        return out + b[None, :, None, None]

    xr = x.reshape(-1, w1.shape[0], 1, 1)
    y1 = deconv(xr, w1, b1, 2, 1)
    mean = y1.mean(axis=(0, 2, 3), keepdims=True)
    var = ((y1 - mean) ** 2).mean(axis=(0, 2, 3), keepdims=True)
    y1 = (y1 - mean) / jnp.sqrt(var + BN_EPS) * gamma1[None, :, None, None] \
        + beta1[None, :, None, None]
    y1 = jnp.maximum(y1, LEAKY_SLOPE * y1)
    y2 = deconv(y1, w2, b2, 2, 1)
    return jnp.maximum(y2, LEAKY_SLOPE * y2)


if __name__ == "__main__":
    # FlatToConv(channel_size=[32, 16, 8], ks=4, s=2, a=LeakyReLU(0.2), p=1)
    N, C0, C1, C2, KS = 4, 32, 16, 8, 4
    key = jax.random.PRNGKey(0)
    kx, k1, kb1, k2, kb2, kg, kbeta, kx2 = jax.random.split(key, 8)

    def uinit(k, shape, fan):
        bound = 1.0 / np.sqrt(fan)
        return jax.random.uniform(k, shape, jnp.float32, -bound, bound)

    x = jax.random.normal(kx, (N, C0), jnp.float32)
    w1 = uinit(k1, (C0, C1, KS, KS), C0 * KS * KS)     # ConvTranspose2d weight: (Cin, Cout, kh, kw)
    b1 = uinit(kb1, (C1,), C0 * KS * KS)
    gamma1 = 1.0 + 0.1 * jax.random.normal(kg, (C1,), jnp.float32)   # exercise BN affine fold
    beta1 = 0.1 * jax.random.normal(kbeta, (C1,), jnp.float32)
    w2 = uinit(k2, (C1, C2, KS, KS), C1 * KS * KS)
    b2 = uinit(kb2, (C2,), C1 * KS * KS)
    params = (w1, b1, gamma1, beta1, w2, b2)

    # bf16 MXU operands / bf16 output -> compare against the f32 reference at bf16 tolerance
    out = jax.block_until_ready(flat_to_conv_forward(x, params))
    ref = jax_reference(x, *params)
    np.testing.assert_allclose(np.asarray(out), np.asarray(ref), rtol=2e-2, atol=2e-2)

    # multi-tile batch path: cross-tile BN stat accumulation, no-row-padding fast path
    x_big = jax.random.normal(kx2, (32, C0), jnp.float32)
    out_big = jax.block_until_ready(flat_to_conv_forward(x_big, params, tile_rows=16))
    ref_big = jax_reference(x_big, *params)
    np.testing.assert_allclose(np.asarray(out_big), np.asarray(ref_big), rtol=2e-2, atol=2e-2)

    print("KERNEL_OK")
</pallas_src>

<mosaic_0001>
module attributes {stable_mosaic.version = 11 : i64} {
  func.func @_stats_kernel(%arg0: i32, %arg1: memref<16x32xbf16, #tpu.memory_space<vmem>>, %arg2: memref<32x128xbf16, #tpu.memory_space<vmem>>, %arg3: memref<2x128xf32, #tpu.memory_space<vmem>>) attributes {dimension_semantics = [#tpu.dimension_semantics<arbitrary>], iteration_bounds = array<i64: 1>, scalar_prefetch = 0 : i64, scratch_operands = 0 : i64, tpu.core_type = #tpu.core_type<tc>, window_params = [{transform_indices = @transform_0, window_bounds = array<i64: 16, 32>}, {pipeline_mode = #tpu.pipeline_mode<synchronous>, transform_indices = @transform_1, window_bounds = array<i64: 32, 128>}, {pipeline_mode = #tpu.pipeline_mode<synchronous>, transform_indices = @transform_2, window_bounds = array<i64: 2, 128>}]} {
    %c0_i32 = arith.constant 0 : i32
    %0 = arith.cmpi eq, %arg0, %c0_i32 : i32
    %1 = arith.extui %0 : i1 to i32
    %c0_i32_0 = arith.constant 0 : i32
    %2 = arith.cmpi ne, %1, %c0_i32_0 : i32
    scf.if %2 {
      %cst_10 = arith.constant 0.000000e+00 : f32
      %15 = vector.broadcast %cst_10 : f32 to vector<2x128xf32>
      %c0_11 = arith.constant 0 : index
      %c0_12 = arith.constant 0 : index
      %16 = vector.load %arg3[%c0_11, %c0_12] : memref<2x128xf32, #tpu.memory_space<vmem>>, vector<2x128xf32>
      tpu.vector_store %arg3[%c0_11, %c0_12], %15 {strides = array<i32>} : memref<2x128xf32, #tpu.memory_space<vmem>>, vector<2x128xf32>,
    } else {
    }
    %c0 = arith.constant 0 : index
    %c0_1 = arith.constant 0 : index
    %3 = vector.load %arg1[%c0, %c0_1] : memref<16x32xbf16, #tpu.memory_space<vmem>>, vector<16x32xbf16>
    %c0_2 = arith.constant 0 : index
    %c0_3 = arith.constant 0 : index
    %4 = vector.load %arg2[%c0_2, %c0_3] : memref<32x128xbf16, #tpu.memory_space<vmem>>, vector<32x128xbf16>
    %cst = arith.constant dense<0.000000e+00> : vector<16x128xf32>
    %5 = tpu.matmul %3, %4, %cst {dimension_numbers = #tpu.dot_dimension_numbers<[1], [0], [0], [1], [0, 0, 1, 1], [], []>} : vector<16x32xbf16>, vector<32x128xbf16>, vector<16x128xf32> -> vector<16x128xf32>
    %cst_4 = arith.constant dense<0.000000e+00> : vector<128xf32>
    %6 = vector.multi_reduction <add>, %5, %cst_4 [0] : vector<16x128xf32> to vector<128xf32>
    %7 = vector.shape_cast %6 : vector<128xf32> to vector<1x128xf32>
    %8 = arith.mulf %5, %5 : vector<16x128xf32>
    %cst_5 = arith.constant dense<0.000000e+00> : vector<128xf32>
    %9 = vector.multi_reduction <add>, %8, %cst_5 [0] : vector<16x128xf32> to vector<128xf32>
    %10 = vector.shape_cast %9 : vector<128xf32> to vector<1x128xf32>
    %c0_6 = arith.constant 0 : index
    %c0_7 = arith.constant 0 : index
    %11 = vector.load %arg3[%c0_6, %c0_7] : memref<2x128xf32, #tpu.memory_space<vmem>>, vector<2x128xf32>
    %12 = tpu.concatenate %7, %10 in 0 : vector<1x128xf32>, vector<1x128xf32> -> vector<2x128xf32>
    %13 = arith.addf %11, %12 : vector<2x128xf32>
    %c0_8 = arith.constant 0 : index
    %c0_9 = arith.constant 0 : index
    %14 = vector.load %arg3[%c0_8, %c0_9] : memref<2x128xf32, #tpu.memory_space<vmem>>, vector<2x128xf32>
    tpu.vector_store %arg3[%c0_8, %c0_9], %13 {strides = array<i32>} : memref<2x128xf32, #tpu.memory_space<vmem>>, vector<2x128xf32>,
    return
  }
  func.func @transform_0(%arg0: i32) -> (i32, i32) {
    %c0_i32 = arith.constant 0 : i32
    %c0_i32_0 = arith.constant 0 : i32
    return %arg0, %c0_i32 : i32, i32
  }
  func.func @transform_1(%arg0: i32) -> (i32, i32) {
    %c0_i32 = arith.constant 0 : i32
    %c0_i32_0 = arith.constant 0 : i32
    %c0_i32_1 = arith.constant 0 : i32
    return %c0_i32, %c0_i32_0 : i32, i32
  }
  func.func @transform_2(%arg0: i32) -> (i32, i32) {
    %c0_i32 = arith.constant 0 : i32
    %c0_i32_0 = arith.constant 0 : i32
    %c0_i32_1 = arith.constant 0 : i32
    return %c0_i32, %c0_i32_0 : i32, i32
  }
}

</mosaic_0001>

<bundles_post_ra>
// kernel: tpu_custom_call.1
= control target key start
LH: loop header
LB: loop body
LE: loop exit
PB: predicated region body
PF: predicated region fallthrough
CT: control target
= control target key end

     0   :  { %7 = vsyncpa [#allocation3], 0  ;;  %s306_s0 = inlined_call_operand.hbm [shape: bf16[16,32], index: 0, kind: input, shape index: {}]   ;;  %s307_s1 = inlined_call_operand.hbm [shape: bf16[32,128], index: 1, kind: input, shape index: {}]   ;;  %s308_s2 = inlined_call_operand.hbm [shape: f32[2,128], index: 2, kind: output, shape index: {}]  }
   0x1   :  { %8 = vsyncpa [#allocation6], 0 }
   0x2   :  { %9 = vsyncpa [#allocation4], 0  ;;  %s248_s9 = smov [#allocation2]   ;;  %s176_s13 = scalar_lea.hbm %s306_s0, 128 }
   0x3   :  { %s15_s10 = sshll.u32 %s248_s9, 4  ;;  %p177_p0 = scmp.ne.s32.totalorder %s306_s0, %s176_s13  ;;  %s16_s10 = int_to_ptr.vmem [resolvable:$true] %s15_s10 }
   0x4   :  { %p180_p1 = scmp.lt.u32.totalorder %s176_s13, %s306_s0 }
   0x6   :  { %p182_p2 = pnand %p180_p1, %p177_p0 }
   0x8   :  { %185 = shalt.err (!%p182_p2)
}
   0x9   :  { %s186_s18 = scalar_lea.vmem %s16_s10, 128  ;;  %p191_p4 = scmp.lt.s32.totalorder %s16_s10, %s16_s10 }
   0xa   :  { %p187_p3 = scmp.ne.s32.totalorder %s16_s10, %s186_s18  ;;  %p192_p5 = scmp.lt.s32.totalorder %s186_s18, %s186_s18 }
   0xc   :  { %p193_p6 = por %p192_p5, %p191_p4 }
   0xe   :  { %p194_p7 = pnand %p193_p6, %p187_p3 }
  0x10   :  { %197 = shalt.err (!%p194_p7)
}
  0x11   :  { %s249_s19 = smov 64   ;;  %s250_s20 = smov 4  }
  0x12   :  { %21 = dma.hbm_to_vmem [thread:$0]  %s306_s0, 128, %s16_s10, [#allocation3], %s249_s19, %s249_s19, %s250_s20  }
  0x13   :  { %s251_s23 = smov [#allocation5]   ;;  %s198_s27 = scalar_lea.hbm %s307_s1, 256 }
  0x14   :  { %s27_s24 = sshll.u32 %s251_s23, 4  ;;  %p199_p8 = scmp.ne.s32.totalorder %s307_s1, %s198_s27  ;;  %s28_s24 = int_to_ptr.vmem [resolvable:$true] %s27_s24 }
  0x15   :  { %p202_p9 = scmp.lt.u32.totalorder %s198_s27, %s307_s1 }
  0x17   :  { %p204_p10 = pnand %p202_p9, %p199_p8 }
  0x19   :  { %207 = shalt.err (!%p204_p10)
}
  0x1a   :  { %s208_s4 = scalar_lea.vmem %s28_s24, 256  ;;  %p213_p12 = scmp.lt.s32.totalorder %s28_s24, %s28_s24 }
  0x1b   :  { %p209_p11 = scmp.ne.s32.totalorder %s28_s24, %s208_s4  ;;  %p214_p13 = scmp.lt.s32.totalorder %s208_s4, %s208_s4 }
  0x1d   :  { %p215_p0 = por %p214_p13, %p213_p12 }
  0x1f   :  { %p216_p1 = pnand %p215_p0, %p209_p11 }
  0x21   :  { %219 = shalt.err (!%p216_p1)
}
  0x22   :  { %33 = dma.hbm_to_vmem [thread:$0]  %s307_s1, 256, %s28_s24, [#allocation6], %s249_s19, %s249_s19, %s250_s20  }
  0x23   :  { %242 = dma.done.wait [#allocation3], 128  }
  0x24   :  { %243 = vsyncadd [#allocation3], 4294967168 }
  0x25   :  { %244 = dma.done.wait [#allocation6], 256  }
  0x26   :  { %245 = vsyncadd [#allocation6], 4294967040  ;;  %v252_v0 = vmov 0.0   ;;  %vm253_vm0 = vmmov 0   ;;  %v173_v1 = vld [vmem:[#allocation5] sm:$0xff]   ;;  %v174_v2 = vld [vmem:[#allocation5 + $0x8] sm:$0xff]  }
  0x27   :  { %158 = vmatprep.subr.bf16.mxu0 %v252_v0  ;;  %45 = vst [vmem:[#allocation7] sm:$0x3] %v252_v0  ;;  %162 = vmatprep.mubr.msk.bf16.mxu0 %vm253_vm0, %v252_v0  ;;  %v175_v3 = vld [vmem:[#allocation2] sm:$0xff]   ;;  %vm69_vm1 = vcmask 261120   ;;  %vm131_vm2 = vcmask 1040384   ;;  %s254_s1 = smov [#allocation7]  }
  0x28   :  { %159 = vmatpush3.bf16.msra.mxu0 %v173_v1  ;;  %s141_s6 = sshll.u32 %s254_s1, 4  ;;  %s142_s6 = int_to_ptr.vmem [resolvable:$true] %s141_s6 }
  0x29   :  { %160 = vmatprep.subr.bf16.mxu0 %v252_v0  ;;  %s220_s7 = scalar_lea.vmem %s142_s6, 32  ;;  %p225_p3 = scmp.lt.s32.totalorder %s142_s6, %s142_s6 }
  0x2a   :  { %p221_p2 = scmp.ne.s32.totalorder %s142_s6, %s220_s7  ;;  %p226_p4 = scmp.lt.s32.totalorder %s220_s7, %s220_s7 }
  0x2c   :  { %161 = vmatpush3.bf16.msra.mxu0 %v174_v2  ;;  %p227_p5 = por %p226_p4, %p225_p3 }
  0x2e   :  { %v130_v24 = vld [vmem:[#allocation7] sm:$0x3]  ;;  %p228_p6 = pnand %p227_p5, %p221_p2 }
  0x2f   :  { %163 = vmatmul.mubr.msk.bf16.vlgmr.msra.gmra.mrb[0].mxu0 %vm69_vm1, %v175_v3 }
 0x102   :  { %v107_v4 = vpop.f32.mrb[0].mxu0 }
 0x103   :  { %v164_v5 = vpop.f32.mrb[1].mxu0  ;;  %v121_v7 = vmul.f32 %v107_v4, %v107_v4 }
 0x104   :  { %v110_v6 = vpop.f32.mrb[2].mxu0 }
 0x105   :  { %v114_v8 = vadd.f32 %v110_v6, %v107_v4  ;;  %v122_v9 = vmul.f32 %v110_v6, %v110_v6  ;;  %v165_v10 = vpop.f32.mrb[3].mxu0 }
 0x107   :  { %v115_v11 = vrot.slane %v114_v8, 4  ;;  %v123_v12 = vadd.f32 %v122_v9, %v121_v7 }
 0x109   :  { %v116_v13 = vadd.f32 %v115_v11, %v114_v8  ;;  %v124_v14 = vrot.slane %v123_v12, 4 }
 0x10b   :  { %v117_v15 = vrot.slane %v116_v13, 2  ;;  %v125_v16 = vadd.f32 %v124_v14, %v123_v12 }
 0x10d   :  { %v118_v17 = vadd.f32 %v117_v15, %v116_v13  ;;  %v126_v18 = vrot.slane %v125_v16, 2 }
 0x10f   :  { %v119_v19 = vrot.slane %v118_v17, 1  ;;  %v127_v20 = vadd.f32 %v126_v18, %v125_v16 }
 0x111   :  { %v128_v21 = vrot.slane %v127_v20, 1  ;;  %v120_v22 = vadd.f32 %v119_v19, %v118_v17 }
 0x113   :  { %v129_v23 = vadd.f32 %v128_v21, %v127_v20 }
 0x115   :  { %v132_v25 = vsel %vm131_vm2, %v120_v22, %v129_v23 }
 0x116   :  { %v133_v26 = vadd.f32 %v132_v25, %v130_v24 }
 0x118   :  { %134 = vst [vmem:[#allocation7] sm:$0x3] %v133_v26 }
 0x119   :  { %231 = shalt.err (!%p228_p6)
}
 0x11a   :  { %s232_s10 = scalar_lea.hbm %s308_s2, 32 }
 0x11b   :  { %p233_p7 = scmp.ne.s32.totalorder %s308_s2, %s232_s10  ;;  %p236_p8 = scmp.lt.u32.totalorder %s232_s10, %s308_s2 }
 0x11d   :  { %p238_p9 = pnand %p236_p8, %p233_p7 }
 0x11f   :  { %241 = shalt.err (!%p238_p9)
}
 0x120   :  { %144 = dma.vmem_to_hbm [thread:$0]  %s142_s6, 32, %s308_s2, [#allocation4]  }
 0x121   :  { %246 = dma.done.wait [#allocation4], 32  }
 0x122   :  { %247 = vsyncadd [#allocation4], 4294967264 }
 0x123   :  { %148 = vsyncpa [#allocation3], 1 }
 0x124   :  { %149 = vsyncpa [#allocation6], 1 }
 0x125   :  { %150 = vsyncpa [#allocation4], 1 }

</bundles_post_ra>
